<compile_context>
chip_gen: v7x
topology: tpu7x:2x2x1
jax: 0.10.0
libtpu: 0.0.40
codegen_flags: <defaults>
</compile_context>

<pallas_src>
import functools
import math

import jax
import jax.numpy as jnp
from jax.experimental import pallas as pl
from jax.experimental.pallas import tpu as pltpu

_F32 = jnp.float32
_BF16 = jnp.bfloat16
_VMEM_LIMIT = 48 * 1024 * 1024   # headroom under v7x's 64 MiB physical VMEM
_NEG = -1.0e30                   # maxpool pad (inputs are post-ReLU, bf16-representable)


def _rup(x, m):
    return (x + m - 1) // m * m


# ------------------------------ Pallas kernels ------------------------------

def _mm_kernel(a_ref, b_ref, s_ref, c_ref, *rest, relu, has_resid, multi_k):
    """out = [relu]( A @ B * scale + shift [+ residual] ), bf16 output.

    multi_k=False: the whole K contraction happens in one grid step (single MXU dot,
    no accumulator round-trip).  multi_k=True: K grid axis with an f32 VMEM scratch
    accumulator (only used when the full-K weight tile would not fit VMEM)."""
    if has_resid:
        r_ref = rest[0]
        rest = rest[1:]
    else:
        r_ref = None
    o_ref = rest[0]
    acc_ref = rest[1] if multi_k else None

    def _epilogue(acc):
        y = acc * s_ref[...] + c_ref[...]
        if r_ref is not None:
            y = y + r_ref[...].astype(jnp.float32)
        if relu:
            y = jnp.maximum(y, 0.0)
        o_ref[...] = y.astype(o_ref.dtype)

    if not multi_k:
        _epilogue(jnp.dot(a_ref[...], b_ref[...], preferred_element_type=jnp.float32))
    else:
        k = pl.program_id(2)

        @pl.when(k == 0)
        def _():
            acc_ref[...] = jnp.zeros_like(acc_ref)

        acc_ref[...] += jnp.dot(a_ref[...], b_ref[...],
                                preferred_element_type=jnp.float32)

        @pl.when(k == pl.num_programs(2) - 1)
        def _():
            _epilogue(acc_ref[...])


def _max9_kernel(*refs):
    """Elementwise max over the 9 pooling taps (VPU max tree)."""
    o_ref = refs[-1]
    m = refs[0][...]
    for r in refs[1:-1]:
        m = jnp.maximum(m, r[...])
    o_ref[...] = m


def _mean_hw_kernel(x_ref, o_ref):           # (bn, HW, C) -> (bn, C): global avg-pool
    o_ref[...] = jnp.mean(x_ref[...].astype(jnp.float32), axis=1).astype(o_ref.dtype)


def _lstm_kernel(xw_ref, whh_ref, f_ref, h_ref, c_ref, acc_ref, *, inv_t):
    """One timestep per grid iteration; h/c + running mean carried in VMEM scratch.
    The time-mean (avg_pool1d over t) is fused: only the (b, hidden) mean hits HBM."""
    s = pl.program_id(0)

    @pl.when(s == 0)
    def _():
        h_ref[...] = jnp.zeros_like(h_ref)
        c_ref[...] = jnp.zeros_like(c_ref)
        acc_ref[...] = jnp.zeros_like(acc_ref)

    H = h_ref.shape[1]
    gates = xw_ref[0] + jnp.dot(h_ref[...].astype(whh_ref.dtype), whh_ref[...],
                                preferred_element_type=jnp.float32)
    ig = jax.nn.sigmoid(gates[:, 0:H])          # PyTorch gate order: i, f, g, o
    fg = jax.nn.sigmoid(gates[:, H:2 * H])
    gg = jnp.tanh(gates[:, 2 * H:3 * H])
    og = jax.nn.sigmoid(gates[:, 3 * H:4 * H])
    c = fg * c_ref[...] + ig * gg
    h = og * jnp.tanh(c)
    c_ref[...] = c
    h_ref[...] = h
    acc_ref[...] += h

    @pl.when(s == pl.num_programs(0) - 1)
    def _():
        f_ref[...] = (acc_ref[...] * inv_t).astype(f_ref.dtype)


# ------------------------------ tiling plans ------------------------------

def _plan_m(M):
    if M <= 8:
        return M, M                      # full-dim block, no row padding
    for t in (512, 256, 128, 64, 32, 16, 8):
        if M % t == 0:
            return t, M
    tm = min(512, _rup(M, 8))
    return tm, _rup(M, tm)


def _plan_n(N):
    if N <= 2048:
        return N                         # full-width output tile: A read once from HBM
    for t in (2048, 1024, 512, 256, 128):
        if N % t == 0:
            return t
    return N


def _plan_k(K, tm, tn, has_resid):
    """Prefer the whole K in one step (single dot, no accumulator traffic); fall back
    to a K grid axis (tk multiple of 256/128) only if the weight tile won't fit."""
    def step_bytes(tk):
        a = 2 * tm * tk * 2              # bf16, double-buffered
        b = 2 * tk * tn * 2
        o = 2 * tm * tn * 2
        r = 2 * tm * tn * 2 if has_resid else 0
        sc = 2 * 2 * tn * 4
        acc = tm * tn * 4
        return a + b + o + r + sc + acc
    budget = _VMEM_LIMIT - (4 << 20)
    if step_bytes(K) <= budget:
        return K, False
    for t in (2048, 1024, 512, 256, 128):
        if K % t == 0 and step_bytes(t) <= budget:
            return t, True
    return K, False                      # last resort (never hit for this network)


# ------------------------------ Pallas wrappers ------------------------------

def matmul_affine(a, pack, relu, residual=None, out_dtype=_BF16):
    """out = [relu]( a @ W * scale + shift [+ residual] ).
    `a` is expected in bf16 (activations are carried in bf16); residual is bf16."""
    M, K = a.shape
    Kp, N = pack["w"].shape
    a = a.astype(_BF16)
    if K != Kp:                          # only the 7x7 stem (K=147 -> 256) pays this
        a = jnp.pad(a, ((0, 0), (0, Kp - K)))
    tm, Mp = _plan_m(M)
    if Mp != M:
        a = jnp.pad(a, ((0, Mp - M), (0, 0)))
    tn = _plan_n(N)
    tk, multi_k = _plan_k(Kp, tm, tn, residual is not None)

    in_specs = [
        pl.BlockSpec((tm, tk), lambda i, j, k: (i, k)),
        pl.BlockSpec((tk, tn), lambda i, j, k: (k, j)),
        pl.BlockSpec((1, tn), lambda i, j, k: (0, j)),
        pl.BlockSpec((1, tn), lambda i, j, k: (0, j)),
    ]
    args = [a, pack["w"], pack["s"], pack["c"]]
    if residual is not None:
        r = residual.astype(_BF16)
        if Mp != M:
            r = jnp.pad(r, ((0, Mp - M), (0, 0)))
        in_specs.append(pl.BlockSpec((tm, tn), lambda i, j, k: (i, j)))
        args.append(r)
    scratch = [pltpu.VMEM((tm, tn), jnp.float32)] if multi_k else []

    out = pl.pallas_call(
        functools.partial(_mm_kernel, relu=relu,
                          has_resid=residual is not None, multi_k=multi_k),
        out_shape=jax.ShapeDtypeStruct((Mp, N), out_dtype),
        grid=(Mp // tm, N // tn, Kp // tk),
        in_specs=in_specs,
        out_specs=pl.BlockSpec((tm, tn), lambda i, j, k: (i, j)),
        scratch_shapes=scratch,
        compiler_params=pltpu.CompilerParams(
            dimension_semantics=("parallel", "parallel", "arbitrary"),
            vmem_limit_bytes=_VMEM_LIMIT),
    )(*args)
    if Mp != M:
        out = out[:M]
    return out


def maxpool_3x3_s2(x):
    """MaxPool2d(kernel=3, stride=2, padding=1) on NHWC bf16: 9 shifted taps (bf16,
    natural C kept as a full-dim block) + a row-tiled elementwise max tree."""
    N, H, W, C = x.shape
    Ho = (H + 2 - 3) // 2 + 1
    Wo = (W + 2 - 3) // 2 + 1
    xp = jnp.pad(x, ((0, 0), (1, 1), (1, 1), (0, 0)), constant_values=_NEG)
    M = N * Ho * Wo
    tm, Mp = _plan_m(M)
    cols = []
    for i in range(3):
        for j in range(3):
            c = xp[:, i:i + 2 * Ho:2, j:j + 2 * Wo:2, :].reshape(M, C)
            if Mp != M:
                c = jnp.pad(c, ((0, Mp - M), (0, 0)), constant_values=_NEG)
            cols.append(c)
    spec = pl.BlockSpec((tm, C), lambda i: (i, 0))
    out = pl.pallas_call(
        _max9_kernel,
        out_shape=jax.ShapeDtypeStruct((Mp, C), x.dtype),
        grid=(Mp // tm,),
        in_specs=[spec] * 9,
        out_specs=spec,
        compiler_params=pltpu.CompilerParams(
            dimension_semantics=("parallel",),
            vmem_limit_bytes=_VMEM_LIMIT),
    )(*cols)
    if Mp != M:
        out = out[:M]
    return out.reshape(N, Ho, Wo, C)


def global_avgpool2d(x):
    """F.avg_pool2d(x, x.size()[2:]) on NHWC bf16; small (8, HW, C) blocks so it fits
    default/physical VMEM even at 224x224 inputs."""
    N, H, W, C = x.shape
    HW = H * W
    xr = x.reshape(N, HW, C)
    bn = 8 if N >= 8 else N
    Nr = _rup(N, bn)
    if Nr != N:
        xr = jnp.pad(xr, ((0, Nr - N), (0, 0), (0, 0)))
    out = pl.pallas_call(
        _mean_hw_kernel,
        out_shape=jax.ShapeDtypeStruct((Nr, C), x.dtype),
        grid=(Nr // bn,),
        in_specs=[pl.BlockSpec((bn, HW, C), lambda i: (i, 0, 0))],
        out_specs=pl.BlockSpec((bn, C), lambda i: (i, 0)),
        compiler_params=pltpu.CompilerParams(
            dimension_semantics=("parallel",),
            vmem_limit_bytes=_VMEM_LIMIT),
    )(xr)
    return out[:N] if Nr != N else out


def lstm_mean_forward(x_seq, lp, hidden_dim):
    """Single-layer LSTM (batch_first=False, PyTorch i/f/g/o order) with the mean over
    time fused into the recurrence kernel. Returns f = mean_t(h_t), shape (b, hidden)."""
    t, b, feat = x_seq.shape
    H4 = 4 * hidden_dim
    # x_t @ W_ih^T + (b_ih + b_hh) for all timesteps via the tiled MXU matmul (f32 out).
    xw = matmul_affine(x_seq.reshape(t * b, feat), lp["xw_pack"],
                       relu=False, out_dtype=_F32).reshape(t, b, H4)
    f = pl.pallas_call(
        functools.partial(_lstm_kernel, inv_t=1.0 / t),
        out_shape=jax.ShapeDtypeStruct((b, hidden_dim), _F32),
        grid=(t,),
        in_specs=[
            pl.BlockSpec((1, b, H4), lambda s: (s, 0, 0)),
            pl.BlockSpec((hidden_dim, H4), lambda s: (0, 0)),   # constant index: one DMA
        ],
        out_specs=pl.BlockSpec((b, hidden_dim), lambda s: (0, 0)),
        scratch_shapes=[pltpu.VMEM((b, hidden_dim), jnp.float32)] * 3,
        compiler_params=pltpu.CompilerParams(
            dimension_semantics=("arbitrary",),
            vmem_limit_bytes=_VMEM_LIMIT),
    )(xw, lp["w_hh_t"])
    return f


# --------------------------- ResNet-50 building blocks ---------------------------

def _im2col(x, ksize, stride, pad):
    """bf16 im2col, tap-major K layout [(0,0) all C, (0,1) all C, ...]."""
    N, H, W, C = x.shape
    if pad:
        x = jnp.pad(x, ((0, 0), (pad, pad), (pad, pad), (0, 0)))
    Ho = (H + 2 * pad - ksize) // stride + 1
    Wo = (W + 2 * pad - ksize) // stride + 1
    cols = [x[:, i:i + stride * Ho:stride, j:j + stride * Wo:stride, :]
            for i in range(ksize) for j in range(ksize)]
    patches = jnp.concatenate(cols, axis=-1)
    return patches.reshape(N * Ho * Wo, ksize * ksize * C), (N, Ho, Wo)


def conv_bn(x, p, stride, relu, residual=None):
    ks, pad = p["ks"], p["pad"]
    N, H, W, C = x.shape
    if ks == 1 and pad == 0:
        if stride == 1:
            Ho, Wo = H, W
            patches = x.reshape(N * H * W, C)          # free reshape, no copy
        else:
            Ho = (H - 1) // stride + 1
            Wo = (W - 1) // stride + 1
            patches = x[:, ::stride, ::stride, :].reshape(N * Ho * Wo, C)
    else:
        patches, (N, Ho, Wo) = _im2col(x, ks, stride, pad)
    y = matmul_affine(patches, p["pack"], relu=relu, residual=residual)
    return y.reshape(N, Ho, Wo, -1)


def bottleneck(x, blk):
    s = blk["stride"]
    out = conv_bn(x, blk["conv1"], 1, True)
    out = conv_bn(out, blk["conv2"], s, True)
    identity = conv_bn(x, blk["down"], s, False) if "down" in blk else x
    id_flat = identity.reshape(-1, identity.shape[-1])      # bf16, no copy
    # conv3 + BN + residual-add + ReLU fused in one matmul epilogue.
    out = conv_bn(out, blk["conv3"], 1, relu=True, residual=id_flat)
    return out


# ------------------------------ parameter init ------------------------------

def _pack_weight(w, scale, shift, k_pad_to=None):
    """bf16 weight (K[, padded], N), f32 scale/shift (1, N). No N padding (full-dim
    tiles); K padded only for the stem's K=147."""
    K, N = w.shape
    if k_pad_to is not None and k_pad_to > K:
        w = jnp.pad(w, ((0, k_pad_to - K), (0, 0)))
    return {
        "w": w.astype(_BF16),
        "s": scale.astype(_F32).reshape(1, N),
        "c": shift.astype(_F32).reshape(1, N),
    }


def _conv_bn_init(key, cin, cout, ksize, pad, k_pad_to=None):
    k1, k2, k3, k4, k5 = jax.random.split(key, 5)
    fan_in = ksize * ksize * cin
    w = jax.random.normal(k1, (fan_in, cout), _F32) * math.sqrt(2.0 / fan_in)
    gamma = 1.0 + 0.1 * jax.random.normal(k2, (cout,), _F32)
    beta = 0.05 * jax.random.normal(k3, (cout,), _F32)
    rmean = 0.05 * jax.random.normal(k4, (cout,), _F32)
    rvar = 1.0 + 0.1 * jax.random.uniform(k5, (cout,), _F32)
    scale = gamma / jnp.sqrt(rvar + 1e-5)          # folded inference BatchNorm
    shift = beta - rmean * scale
    return {"pack": _pack_weight(w, scale, shift, k_pad_to), "ks": ksize, "pad": pad}


def init_params(key, num_classes, hidden_dim=512):
    counter = [0]

    def nk():
        counter[0] += 1
        return jax.random.fold_in(key, counter[0])

    # Stem: K = 7*7*3 = 147, padded to 256 so the one-off patch pad is the only pad pass.
    params = {"stem": _conv_bn_init(nk(), 3, 64, 7, 3, k_pad_to=256), "layers": []}
    in_ch = 64
    for width, n_blocks, stride in [(64, 3, 1), (128, 4, 2), (256, 6, 2), (512, 3, 2)]:
        blocks = []
        for bi in range(n_blocks):
            s = stride if bi == 0 else 1
            blk = {
                "conv1": _conv_bn_init(nk(), in_ch, width, 1, 0),
                "conv2": _conv_bn_init(nk(), width, width, 3, 1),
                "conv3": _conv_bn_init(nk(), width, width * 4, 1, 0),
                "stride": s,
            }
            if s != 1 or in_ch != width * 4:
                blk["down"] = _conv_bn_init(nk(), in_ch, width * 4, 1, 0)
            blocks.append(blk)
            in_ch = width * 4
        params["layers"].append(blocks)

    feat_dim = in_ch  # 2048
    H4 = 4 * hidden_dim
    std = 1.0 / math.sqrt(hidden_dim)
    w_ih_t = jax.random.uniform(nk(), (feat_dim, H4), _F32, -std, std)
    w_hh_t = jax.random.uniform(nk(), (hidden_dim, H4), _F32, -std, std)
    b_ih = jax.random.uniform(nk(), (H4,), _F32, -std, std)
    b_hh = jax.random.uniform(nk(), (H4,), _F32, -std, std)
    params["lstm"] = {
        "xw_pack": _pack_weight(w_ih_t, jnp.ones((H4,), _F32), b_ih + b_hh),
        "w_hh_t": w_hh_t.astype(_BF16),   # recurrence weight resident in bf16
    }
    cls_w_t = jax.random.uniform(nk(), (hidden_dim, num_classes), _F32, -std, std)
    cls_b = jax.random.uniform(nk(), (num_classes,), _F32, -std, std)
    params["cls_pack"] = _pack_weight(cls_w_t, jnp.ones((num_classes,), _F32), cls_b)
    params["hidden_dim"] = hidden_dim
    params["feat_dim"] = feat_dim
    return params


# --------------------------------- forward ---------------------------------

def resnet50rnn_forward(params, x):
    """x: (b, t, C, H, W) float32, PyTorch NCHW-per-frame convention.
    Returns (y, f): y = classifier logits (training / 'xent' path),
                    f = time-pooled LSTM feature (eval path)."""
    b, t, C, H, W = x.shape
    h = x.reshape(b * t, C, H, W).transpose(0, 2, 3, 1).astype(_BF16)   # -> NHWC bf16

    h = conv_bn(h, params["stem"], stride=2, relu=True)                # conv1+bn+relu
    h = maxpool_3x3_s2(h)                                              # maxpool
    for blocks in params["layers"]:                                    # layer1..layer4
        for blk in blocks:
            h = bottleneck(h, blk)

    feats = global_avgpool2d(h)                                        # (b*t, 2048) bf16
    x_seq = feats.reshape(b, t, -1).transpose(1, 0, 2)                 # (t, b, 2048)

    f = lstm_mean_forward(x_seq, params["lstm"], params["hidden_dim"])  # (b, 512) f32

    y = matmul_affine(f, params["cls_pack"], relu=False, out_dtype=_F32)  # classifier
    return y, f


# ----------------------------------- main -----------------------------------

if __name__ == "__main__":
    key = jax.random.PRNGKey(0)
    num_classes = 10
    b, t, C, H, W = 2, 4, 3, 32, 32                 # small video clip: (b, t, C, H, W)

    params = init_params(jax.random.fold_in(key, 1), num_classes)
    x = jax.random.normal(jax.random.fold_in(key, 2), (b, t, C, H, W), _F32)

    y, f = resnet50rnn_forward(params, x)
    y = jax.block_until_ready(y)
    f = jax.block_until_ready(f)

    assert y.shape == (b, num_classes)
    assert f.shape == (b, params["hidden_dim"])
    assert bool(jnp.all(jnp.isfinite(y))) and bool(jnp.all(jnp.isfinite(f)))
    print("KERNEL_OK")
</pallas_src>

<mosaic_0001>
module attributes {stable_mosaic.version = 11 : i64} {
  func.func @_mm_kernel(%arg0: i32, %arg1: i32, %arg2: i32, %arg3: memref<512x256xbf16, #tpu.memory_space<vmem>>, %arg4: memref<256x64xbf16, #tpu.memory_space<vmem>>, %arg5: memref<1x64xf32, #tpu.memory_space<vmem>>, %arg6: memref<1x64xf32, #tpu.memory_space<vmem>>, %arg7: memref<512x64xbf16, #tpu.memory_space<vmem>>) attributes {dimension_semantics = [#tpu.dimension_semantics<parallel>, #tpu.dimension_semantics<parallel>, #tpu.dimension_semantics<arbitrary>], iteration_bounds = array<i64: 4, 1, 1>, scalar_prefetch = 0 : i64, scratch_operands = 0 : i64, tpu.core_type = #tpu.core_type<tc>, window_params = [{transform_indices = @transform_0, window_bounds = array<i64: 512, 256>}, {transform_indices = @transform_1, window_bounds = array<i64: 256, 64>}, {transform_indices = @transform_2, window_bounds = array<i64: 1, 64>}, {transform_indices = @transform_3, window_bounds = array<i64: 1, 64>}, {transform_indices = @transform_4, window_bounds = array<i64: 512, 64>}]} {
    %c0 = arith.constant 0 : index
    %c0_0 = arith.constant 0 : index
    %0 = vector.load %arg3[%c0, %c0_0] : memref<512x256xbf16, #tpu.memory_space<vmem>>, vector<512x256xbf16>
    %c0_1 = arith.constant 0 : index
    %c0_2 = arith.constant 0 : index
    %1 = vector.load %arg4[%c0_1, %c0_2] : memref<256x64xbf16, #tpu.memory_space<vmem>>, vector<256x64xbf16>
    %cst = arith.constant dense<0.000000e+00> : vector<512x64xf32>
    %2 = tpu.matmul %0, %1, %cst {dimension_numbers = #tpu.dot_dimension_numbers<[1], [0], [0], [1], [0, 0, 1, 1], [], []>} : vector<512x256xbf16>, vector<256x64xbf16>, vector<512x64xf32> -> vector<512x64xf32>
    %c0_3 = arith.constant 0 : index
    %c0_4 = arith.constant 0 : index
    %3 = vector.load %arg5[%c0_3, %c0_4] : memref<1x64xf32, #tpu.memory_space<vmem>>, vector<1x64xf32>
    %4 = vector.broadcast %3 : vector<1x64xf32> to vector<512x64xf32>
    %5 = arith.mulf %2, %4 : vector<512x64xf32>
    %c0_5 = arith.constant 0 : index
    %c0_6 = arith.constant 0 : index
    %6 = vector.load %arg6[%c0_5, %c0_6] : memref<1x64xf32, #tpu.memory_space<vmem>>, vector<1x64xf32>
    %7 = vector.broadcast %6 : vector<1x64xf32> to vector<512x64xf32>
    %8 = arith.addf %5, %7 : vector<512x64xf32>
    %cst_7 = arith.constant 0.000000e+00 : f32
    %9 = vector.broadcast %cst_7 : f32 to vector<512x64xf32>
    %10 = arith.maximumf %8, %9 : vector<512x64xf32>
    %11 = arith.truncf %10 : vector<512x64xf32> to vector<512x64xbf16>
    %c0_8 = arith.constant 0 : index
    %c0_9 = arith.constant 0 : index
    %12 = vector.load %arg7[%c0_8, %c0_9] : memref<512x64xbf16, #tpu.memory_space<vmem>>, vector<512x64xbf16>
    tpu.vector_store %arg7[%c0_8, %c0_9], %11 {strides = array<i32>} : memref<512x64xbf16, #tpu.memory_space<vmem>>, vector<512x64xbf16>,
    return
  }
  func.func @transform_0(%arg0: i32, %arg1: i32, %arg2: i32) -> (i32, i32) {
    %c0_i32 = arith.constant 0 : i32
    return %arg0, %arg2 : i32, i32
  }
  func.func @transform_1(%arg0: i32, %arg1: i32, %arg2: i32) -> (i32, i32) {
    %c0_i32 = arith.constant 0 : i32
    return %arg2, %arg1 : i32, i32
  }
  func.func @transform_2(%arg0: i32, %arg1: i32, %arg2: i32) -> (i32, i32) {
    %c0_i32 = arith.constant 0 : i32
    %c0_i32_0 = arith.constant 0 : i32
    return %c0_i32, %arg1 : i32, i32
  }
  func.func @transform_3(%arg0: i32, %arg1: i32, %arg2: i32) -> (i32, i32) {
    %c0_i32 = arith.constant 0 : i32
    %c0_i32_0 = arith.constant 0 : i32
    return %c0_i32, %arg1 : i32, i32
  }
  func.func @transform_4(%arg0: i32, %arg1: i32, %arg2: i32) -> (i32, i32) {
    %c0_i32 = arith.constant 0 : i32
    return %arg0, %arg1 : i32, i32
  }
}

</mosaic_0001>

<bundles_post_ra>
// kernel: tpu_custom_call.1
= control target key start
LH: loop header
LB: loop body
LE: loop exit
PB: predicated region body
PF: predicated region fallthrough
CT: control target
= control target key end

     0   :  { %9 = vsyncpa [#allocation3], 0  ;;  %s2856_s0 = inlined_call_operand.hbm [shape: bf16[2048,256], index: 0, kind: input, shape index: {}]   ;;  %s2857_s1 = inlined_call_operand.vmem [shape: bf16[256,64], index: 1, kind: input, shape index: {}]   ;;  %s2858_s2 = inlined_call_operand.vmem [shape: f32[1,64], index: 2, kind: input, shape index: {}]   ;;  %s2859_s3 = inlined_call_operand.vmem [shape: f32[1,64], index: 3, kind: input, shape index: {}]   ;;  %s2860_s4 = inlined_call_operand.vmem [shape: bf16[2048,64], index: 4, kind: output, shape index: {}]  }
   0x1   :  { %11 = vsyncpa [#allocation3 + $0x1], 0  ;;  %s2319_s15 = smov 0   ;;  %s2321_s16 = smov 0  }
   0x2   :  { %s2323_s17 = smov 0   ;;  %s2325_s18 = smov 0  }
   0x3   :  { %s2327_s19 = smov 0   ;;  %s2329_s20 = smov 0  }
   0x4 LB: > { %s1777_s21 = sadd.s32 4294967295, %s2288_s20   ;;  %s36_s22 = sadd.s32 1, %s2284_s19  ;;  %s2288_s20 = sphi %s2329_s20, %s17_s20   ;;  %s2284_s19 = sphi %s2327_s19, %s2868_s19   ;;  %s2280_s18 = sphi %s2325_s18, %s2867_s18   ;;  %s2276_s17 = sphi %s2323_s17, %s2866_s17   ;;  %s2272_s16 = sphi %s2321_s16, %s2865_s16   ;;  %s2268_s15 = sphi %s2319_s15, %s2864_s15  }
   0x5   : > { %p38_p0 = scmp.ge.s32.totalorder %s36_s22, 4  ;;  %s45_s23 = sadd.s32 1, %s2276_s17 }
   0x6   : > { %p52_p1 = scmp.ne.s32.totalorder %s2276_s17, %s2272_s16  ;;  %p53_p2 = scmp.eq.s32.totalorder %s2288_s20, 0 }
   0x7   : > { %s2870_s22 = smov (%p38_p0, %s36_s22), 0  ;;  %p58_p4 = scmp.ne.s32.totalorder %s2272_s16, %s2268_s15 }
   0x8   : > { %p2355_p3 = por %p53_p2, %p52_p1  ;;  %s40_s25 = ssub.s32 %s2284_s19, %s2870_s22 }
   0x9   : > { %p59_p5 = scmp.eq.s32.totalorder %s1777_s21, 0  ;;  %p43_p6 = scmp.eq.s32.totalorder %s40_s25, 0 }
   0xa   : > { %p2044_p8 = scmp.lt.s32.totalorder %s2288_s20, 4  ;;  %s214_s28 = sand.u32 1, %s2276_s17  }
   0xb   : > { %p2362_p7 = por %p59_p5, %p58_p4  ;;  %s1941_s29 = sshll.u32 %s2284_s19, 13 }
   0xc   : > { %s2368_s27 = scalar_select %p43_p6, %s2276_s17, %s45_s23  }
   0xd   : > { %s1784_s30 = sshll.u32 %s214_s28, 9  ;;  %s2375_s7 = scalar_lea.hbm %s2856_s0, %s1941_s29 }
   0xe   : > { %s218_s8 = scalar_lea.vmem [#allocation2], %s1784_s30  ;;  %p2379_p9 = pnand %p2044_p8, %p2355_p3 }
   0xf   : > { %s228_s9 = sshll.u32 %s218_s8, 4  ;;  %s2385_s11 = scalar_lea.sflag [#allocation3], %s214_s28  ;;  %s2383_s9 = int_to_ptr.vmem [resolvable:$true] %s228_s9 }
  0x10   : > { %s2208_s12 = scalar_lea.hbm %s2375_s7, 8192  ;;  %p2210_p11 = pneg %p2379_p9 }
  0x11   : > { %p2209_p10 = scmp.ne.s32.totalorder %s2375_s7, %s2208_s12  ;;  %s2213_s15 = scalar_lea.hbm %s2856_s0, 32768 }
  0x12   : > { %p2214_p0 = scmp.lt.u32.totalorder %s2375_s7, %s2856_s0  ;;  %p2215_p1 = scmp.lt.u32.totalorder %s2213_s15, %s2208_s12 }
  0x13   : > { %p2211_p12 = pnand %p2210_p11, %p2209_p10  ;;  %p2217_p3 = scmp.lt.u32.totalorder %s2208_s12, %s2375_s7 }
  0x14   : > { %p2216_p2 = por %p2215_p1, %p2214_p0 }
  0x15   : > { %p2212_p13 = pneg %p2211_p12 }
  0x16   : > { %p2218_p4 = por %p2217_p3, %p2216_p2 }
  0x18   : > { %p2219_p5 = pnand %p2218_p4, %p2212_p13 }
  0x1a   : > { %2222 = shalt.err (!%p2219_p5)
}
  0x1b   : > { %s2223_s24 = scalar_lea.vmem %s2383_s9, 8192  ;;  %s2290_s25 = smov [#allocation2]  }
  0x1c   : > { %p2224_p6 = scmp.ne.s32.totalorder %s2383_s9, %s2223_s24  ;;  %s2228_s28 = sshll.u32 %s2290_s25, 4  ;;  %s2229_s28 = int_to_ptr.vmem [resolvable:$false] %s2228_s28 }
  0x1d   : > { %s2230_s29 = scalar_lea.vmem %s2229_s28, 16384  ;;  %p2231_p12 = scmp.lt.s32.totalorder %s2383_s9, %s2229_s28 }
  0x1e   : > { %p2226_p8 = pnand %p2224_p6, %p2210_p11  ;;  %p2232_p0 = scmp.lt.s32.totalorder %s2230_s29, %s2223_s24 }
  0x20   : > { %p2227_p10 = pneg %p2226_p8  ;;  %p2233_p1 = por %p2232_p0, %p2231_p12 }
  0x22   : > { %p2234_p2 = pnand %p2233_p1, %p2227_p10 }
  0x24   : > { %2237 = shalt.err (!%p2234_p2)
}
  0x25   : > { %s2291_s30 = smov 128   ;;  %s2292_s5 = smov 8  }
  0x26   : > { %2043 = dma.hbm_to_vmem [thread:$0]  (!%p2379_p9), %s2375_s7, 8192, %s2383_s9, %s2385_s11, %s2291_s30, %s2291_s30, %s2292_s5  }
  0x27   : > { %p1788_p11 = scmp.ge.s32.totalorder %s2288_s20, 1  ;;  %p236_p13 = scmp.lt.s32.totalorder %s2288_s20, 5 }
  0x29   : > { %p237_p3 = pnand %p1788_p11, %p236_p13 }
  0x2a   : > { %s242_s6 = sand.u32 (!%p237_p3), 1, %s2272_s16  }
  0x2b   : > { %240 = sbr.rel (%p237_p3) target bundleno = 459 (0x1cb), region = 36  ;;  %s1789_s8 = sshll.u32 (!%p237_p3), %s242_s6, 9 }
  0x2c   : > { %s243_s12 = scalar_lea.sflag (!%p237_p3), [#allocation3], %s242_s6  ;;  %s2416_s13 = scalar_lea.vmem (!%p237_p3), [#allocation2], %s1789_s8 }
  0x32   : > { %2263 = dma.done.wait (%p2362_p7), %s243_s12, 8192  }
  0x33   : > { %2265 = vsyncadd (%p2362_p7), %s243_s12, 4294959104  ;;  %v2293_v0 = vmov 0   ;;  %v2096_v1 = vld [vmem:[%s2857_s1] sm:$0xff]   ;;  %v2097_v2 = vld [vmem:[%s2857_s1 + $0x8] sm:$0xff]   ;;  %s1790_s5 = sshll.u32 %s2280_s18, 6  ;;  %vm1578_vm0 = vcmask 519168  }
  0x34   : > { %827 = vmatprep.subr.bf16.mxu0 %v2293_v0  ;;  %2006 = vmatprep.subr.bf16.mxu1 %v2293_v0  ;;  %v2098_v3 = vld [vmem:[%s2857_s1 + $0x10] sm:$0xff]   ;;  %v2099_v4 = vld [vmem:[%s2857_s1 + $0x18] sm:$0xff]   ;;  %v2100_v5 = vld [vmem:[%s2857_s1 + $0x20] sm:$0xff]   ;;  %p306_p7 = scmp.lt.s32.totalorder %s1790_s5, 255 }
  0x35   : > { %828 = vmatpush1.bf16.msra.mxu0 %v2096_v1  ;;  %2022 = vmatpush1.bf16.msra.mxu1 %v2096_v1  ;;  %v2114_v6 = vld [vmem:[%s2416_s13 + $0x4] ss:$8 sps:$4 sm:$0xff]   ;;  %v2102_v9 = vld [vmem:[%s2857_s1 + $0x30] sm:$0xff]   ;;  %v2103_v10 = vld [vmem:[%s2857_s1 + $0x38] sm:$0xff]  }
  0x36   : > { %829 = vmatprep.subr.bf16.mxu0 %v2293_v0  ;;  %2007 = vmatprep.subr.bf16.mxu1 %v2293_v0  ;;  %v2101_v7 = vld [vmem:[%s2857_s1 + $0x28] sm:$0xff]   ;;  %v2104_v11 = vld [vmem:[%s2857_s1 + $0x40] sm:$0xff]   ;;  %v2106_v13 = vld [vmem:[%s2857_s1 + $0x50] sm:$0xff]   ;;  %s2872_s5 = smov (!%p306_p7, %s1790_s5), 255 }
  0x37   : > { %v2117_v8 = vld [vmem:[%s2416_s13 + $0x104] ss:$8 sps:$4 sm:$0xff]   ;;  %859 = vmatprep.mubr.bf16.mxu0 %v2114_v6  ;;  %v2107_v14 = vld [vmem:[%s2857_s1 + $0x58] sm:$0xff]   ;;  %v2110_v17 = vld [vmem:[%s2857_s1 + $0x70] sm:$0xff]   ;;  %s1791_s18 = sshll.u32 %s2872_s5, 2 }
  0x38   : > { %987 = vmatprep.mubr.bf16.mxu1 %v2117_v8  ;;  %v2105_v12 = vld [vmem:[%s2857_s1 + $0x48] sm:$0xff]   ;;  %v2108_v15 = vld [vmem:[%s2857_s1 + $0x60] sm:$0xff]   ;;  %v2111_v18 = vld [vmem:[%s2857_s1 + $0x78] sm:$0xff]   ;;  %s2588_s10 = scalar_lea.vmem %s2860_s4, %s1791_s18 }
  0x39   : > { %830 = vmatpush1.bf16.msra.mxu0 %v2097_v2  ;;  %2023 = vmatpush1.bf16.msra.mxu1 %v2097_v2  ;;  %v2109_v16 = vld [vmem:[%s2857_s1 + $0x68] sm:$0xff]   ;;  %v2118_v21 = vld [vmem:[%s2416_s13 + $0x14] ss:$8 sps:$4 sm:$0xff]   ;;  %v2122_v23 = vld [vmem:[%s2416_s13 + $0x10] ss:$8 sps:$4 sm:$0xff]  }
  0x3a   : > { %831 = vmatprep.subr.bf16.mxu0 %v2293_v0  ;;  %2008 = vmatprep.subr.bf16.mxu1 %v2293_v0  ;;  %v2112_v19 = vld [vmem:[%s2416_s13] ss:$8 sps:$4 sm:$0xff]   ;;  %v2120_v22 = vld [vmem:[%s2416_s13 + $0x114] ss:$8 sps:$4 sm:$0xff]   ;;  %v2123_v24 = vld [vmem:[%s2416_s13 + $0x110] ss:$8 sps:$4 sm:$0xff]  }
  0x3b   : > { %v2115_v20 = vld [vmem:[%s2416_s13 + $0x100] ss:$8 sps:$4 sm:$0xff]   ;;  %v2124_v25 = vld [vmem:[%s2416_s13 + $0x24] ss:$8 sps:$4 sm:$0xff]   ;;  %v2130_v29 = vld [vmem:[%s2416_s13 + $0x34] ss:$8 sps:$4 sm:$0xff]  }
  0x3c   : > { %v2126_v26 = vld [vmem:[%s2416_s13 + $0x124] ss:$8 sps:$4 sm:$0xff]   ;;  %v2128_v27 = vld [vmem:[%s2416_s13 + $0x20] ss:$8 sps:$4 sm:$0xff]   ;;  %v2132_v30 = vld [vmem:[%s2416_s13 + $0x134] ss:$8 sps:$4 sm:$0xff]  }
  0x3d   : > { %832 = vmatpush1.bf16.msra.mxu0 %v2098_v3  ;;  %2024 = vmatpush1.bf16.msra.mxu1 %v2098_v3  ;;  %v2129_v28 = vld [vmem:[%s2416_s13 + $0x120] ss:$8 sps:$4 sm:$0xff]   ;;  %v2134_v31 = vld [vmem:[%s2416_s13 + $0x30] ss:$8 sps:$4 sm:$0xff]   ;;  %v2136_v33 = vld [vmem:[%s2416_s13 + $0x44] ss:$8 sps:$4 sm:$0xff]  }
  0x3e   : > { %833 = vmatprep.subr.bf16.mxu0 %v2293_v0  ;;  %2009 = vmatprep.subr.bf16.mxu1 %v2293_v0  ;;  %v2135_v32 = vld [vmem:[%s2416_s13 + $0x130] ss:$8 sps:$4 sm:$0xff]   ;;  %v2138_v34 = vld [vmem:[%s2416_s13 + $0x144] ss:$8 sps:$4 sm:$0xff]   ;;  %v2140_v35 = vld [vmem:[%s2416_s13 + $0x40] ss:$8 sps:$4 sm:$0xff]  }
  0x3f   : > { %v2141_v36 = vld [vmem:[%s2416_s13 + $0x140] ss:$8 sps:$4 sm:$0xff]   ;;  %v2142_v37 = vld [vmem:[%s2416_s13 + $0x54] ss:$8 sps:$4 sm:$0xff]   ;;  %v2146_v39 = vld [vmem:[%s2416_s13 + $0x50] ss:$8 sps:$4 sm:$0xff]  }
  0x40   : > { %v2144_v38 = vld [vmem:[%s2416_s13 + $0x154] ss:$8 sps:$4 sm:$0xff]   ;;  %v2147_v40 = vld [vmem:[%s2416_s13 + $0x150] ss:$8 sps:$4 sm:$0xff]   ;;  %v2148_v41 = vld [vmem:[%s2416_s13 + $0x64] ss:$8 sps:$4 sm:$0xff]  }
  0x41   : > { %834 = vmatpush1.bf16.msra.mxu0 %v2099_v4  ;;  %2025 = vmatpush1.bf16.msra.mxu1 %v2099_v4  ;;  %v2150_v42 = vld [vmem:[%s2416_s13 + $0x164] ss:$8 sps:$4 sm:$0xff]   ;;  %v2152_v43 = vld [vmem:[%s2416_s13 + $0x60] ss:$8 sps:$4 sm:$0xff]   ;;  %v2154_v45 = vld [vmem:[%s2416_s13 + $0x74] ss:$8 sps:$4 sm:$0xff]  }
  0x42   : > { %835 = vmatprep.subr.bf16.mxu0 %v2293_v0  ;;  %2010 = vmatprep.subr.bf16.mxu1 %v2293_v0  ;;  %v2153_v44 = vld [vmem:[%s2416_s13 + $0x160] ss:$8 sps:$4 sm:$0xff]   ;;  %v2156_v46 = vld [vmem:[%s2416_s13 + $0x174] ss:$8 sps:$4 sm:$0xff]   ;;  %v2158_v47 = vld [vmem:[%s2416_s13 + $0x70] ss:$8 sps:$4 sm:$0xff]  }
  0x43   : > { %v2159_v48 = vld [vmem:[%s2416_s13 + $0x170] ss:$8 sps:$4 sm:$0xff]   ;;  %v2160_v49 = vld [vmem:[%s2416_s13 + $0x84] ss:$8 sps:$4 sm:$0xff]   ;;  %v2164_v51 = vld [vmem:[%s2416_s13 + $0x80] ss:$8 sps:$4 sm:$0xff]  }
  0x44   : > { %v2162_v50 = vld [vmem:[%s2416_s13 + $0x184] ss:$8 sps:$4 sm:$0xff]   ;;  %v2165_v52 = vld [vmem:[%s2416_s13 + $0x180] ss:$8 sps:$4 sm:$0xff]   ;;  %v2166_v53 = vld [vmem:[%s2416_s13 + $0x94] ss:$8 sps:$4 sm:$0xff]  }
  0x45   : > { %836 = vmatpush1.bf16.msra.mxu0 %v2100_v5  ;;  %2026 = vmatpush1.bf16.msra.mxu1 %v2100_v5  ;;  %v2168_v54 = vld [vmem:[%s2416_s13 + $0x194] ss:$8 sps:$4 sm:$0xff]   ;;  %v2170_v55 = vld [vmem:[%s2416_s13 + $0x90] ss:$8 sps:$4 sm:$0xff]   ;;  %v2172_v57 = vld [vmem:[%s2416_s13 + $0xa4] ss:$8 sps:$4 sm:$0xff]  }
  0x46   : > { %837 = vmatprep.subr.bf16.mxu0 %v2293_v0  ;;  %2011 = vmatprep.subr.bf16.mxu1 %v2293_v0  ;;  %v2171_v56 = vld [vmem:[%s2416_s13 + $0x190] ss:$8 sps:$4 sm:$0xff]   ;;  %v2174_v58 = vld [vmem:[%s2416_s13 + $0x1a4] ss:$8 sps:$4 sm:$0xff]   ;;  %v2176_v59 = vld [vmem:[%s2416_s13 + $0xa0] ss:$8 sps:$4 sm:$0xff]  }
  0x47   : > { %v2177_v60 = vld [vmem:[%s2416_s13 + $0x1a0] ss:$8 sps:$4 sm:$0xff]   ;;  %v2178_v61 = vld [vmem:[%s2416_s13 + $0xb4] ss:$8 sps:$4 sm:$0xff]   ;;  %v2182_v63 = vld [vmem:[%s2416_s13 + $0xb0] ss:$8 sps:$4 sm:$0xff]  }
  0x48   : > { %v2180_v62 = vld [vmem:[%s2416_s13 + $0x1b4] ss:$8 sps:$4 sm:$0xff]   ;;  %v2184_v1 = vld [vmem:[%s2416_s13 + $0xc4] ss:$8 sps:$4 sm:$0xff]   ;;  %v2188_v3 = vld [vmem:[%s2416_s13 + $0xc0] ss:$8 sps:$4 sm:$0xff]  }
  0x49   : > { %838 = vmatpush1.bf16.msra.mxu0 %v2101_v7  ;;  %2027 = vmatpush1.bf16.msra.mxu1 %v2101_v7  ;;  %v2186_v2 = vld [vmem:[%s2416_s13 + $0x1c4] ss:$8 sps:$4 sm:$0xff]   ;;  %v2189_v4 = vld [vmem:[%s2416_s13 + $0x1c0] ss:$8 sps:$4 sm:$0xff]   ;;  %v2190_v5 = vld [vmem:[%s2416_s13 + $0xd4] ss:$8 sps:$4 sm:$0xff]  }
  0x4a   : > { %839 = vmatprep.subr.bf16.mxu0 %v2293_v0  ;;  %2012 = vmatprep.subr.bf16.mxu1 %v2293_v0  ;;  %v2192_v6 = vld [vmem:[%s2416_s13 + $0x1d4] ss:$8 sps:$4 sm:$0xff]   ;;  %v2194_v7 = vld [vmem:[%s2416_s13 + $0xd0] ss:$8 sps:$4 sm:$0xff]  }
  0x4b   : > { %v2195_v8 = vld [vmem:[%s2416_s13 + $0x1d0] ss:$8 sps:$4 sm:$0xff]  }
  0x4d   : > { %840 = vmatpush1.bf16.msra.mxu0 %v2102_v9  ;;  %2028 = vmatpush1.bf16.msra.mxu1 %v2102_v9  ;;  %v2196_v9 = vld [vmem:[%s2416_s13 + $0xe4] ss:$8 sps:$4 sm:$0xff]  }
  0x4e   : > { %841 = vmatprep.subr.bf16.mxu0 %v2293_v0  ;;  %2013 = vmatprep.subr.bf16.mxu1 %v2293_v0 }
  0x51   : > { %842 = vmatpush1.bf16.msra.mxu0 %v2103_v10  ;;  %2029 = vmatpush1.bf16.msra.mxu1 %v2103_v10  ;;  %v2198_v10 = vld [vmem:[%s2416_s13 + $0x1e4] ss:$8 sps:$4 sm:$0xff]  }
  0x52   : > { %843 = vmatprep.subr.bf16.mxu0 %v2293_v0  ;;  %2014 = vmatprep.subr.bf16.mxu1 %v2293_v0 }
  0x55   : > { %844 = vmatpush1.bf16.msra.mxu0 %v2104_v11  ;;  %2030 = vmatpush1.bf16.msra.mxu1 %v2104_v11  ;;  %v2200_v11 = vld [vmem:[%s2416_s13 + $0xe0] ss:$8 sps:$4 sm:$0xff]  }
  0x56   : > { %845 = vmatprep.subr.bf16.mxu0 %v2293_v0  ;;  %2015 = vmatprep.subr.bf16.mxu1 %v2293_v0 }
  0x59   : > { %846 = vmatpush1.bf16.msra.mxu0 %v2105_v12  ;;  %2031 = vmatpush1.bf16.msra.mxu1 %v2105_v12  ;;  %v2201_v12 = vld [vmem:[%s2416_s13 + $0x1e0] ss:$8 sps:$4 sm:$0xff]  }
  0x5a   : > { %847 = vmatprep.subr.bf16.mxu0 %v2293_v0  ;;  %2016 = vmatprep.subr.bf16.mxu1 %v2293_v0 }
  0x5d   : > { %848 = vmatpush1.bf16.msra.mxu0 %v2106_v13  ;;  %2032 = vmatpush1.bf16.msra.mxu1 %v2106_v13  ;;  %v2202_v13 = vld [vmem:[%s2416_s13 + $0xf4] ss:$8 sps:$4 sm:$0xff]  }
  0x5e   : > { %849 = vmatprep.subr.bf16.mxu0 %v2293_v0  ;;  %2017 = vmatprep.subr.bf16.mxu1 %v2293_v0 }
  0x61   : > { %850 = vmatpush1.bf16.msra.mxu0 %v2107_v14  ;;  %2033 = vmatpush1.bf16.msra.mxu1 %v2107_v14  ;;  %v2204_v14 = vld [vmem:[%s2416_s13 + $0x1f4] ss:$8 sps:$4 sm:$0xff]  }
  0x62   : > { %851 = vmatprep.subr.bf16.mxu0 %v2293_v0  ;;  %2018 = vmatprep.subr.bf16.mxu1 %v2293_v0 }
  0x65   : > { %852 = vmatpush1.bf16.msra.mxu0 %v2108_v15  ;;  %2034 = vmatpush1.bf16.msra.mxu1 %v2108_v15  ;;  %v2206_v15 = vld [vmem:[%s2416_s13 + $0xf0] ss:$8 sps:$4 sm:$0xff]  }
  0x66   : > { %853 = vmatprep.subr.bf16.mxu0 %v2293_v0  ;;  %2019 = vmatprep.subr.bf16.mxu1 %v2293_v0 }
  0x69   : > { %854 = vmatpush1.bf16.msra.mxu0 %v2109_v16  ;;  %2035 = vmatpush1.bf16.msra.mxu1 %v2109_v16  ;;  %v2207_v16 = vld [vmem:[%s2416_s13 + $0x1f0] ss:$8 sps:$4 sm:$0xff]  }
  0x6a   : > { %855 = vmatprep.subr.bf16.mxu0 %v2293_v0  ;;  %2020 = vmatprep.subr.bf16.mxu1 %v2293_v0 }
  0x6d   : > { %856 = vmatpush1.bf16.msra.mxu0 %v2110_v17  ;;  %2036 = vmatpush1.bf16.msra.mxu1 %v2110_v17  ;;  %v2570_v17 = vld [vmem:[%s2858_s2] ss:$0 sm:$0xff] }
  0x6e   : > { %857 = vmatprep.subr.bf16.mxu0 %v2293_v0  ;;  %2021 = vmatprep.subr.bf16.mxu1 %v2293_v0  ;;  %v2183_v0 = vld [vmem:[%s2416_s13 + $0x1b0] ss:$8 sps:$4 sm:$0xff]  }
  0x71   : > { %858 = vmatpush1.bf16.msra.mxu0 %v2111_v18  ;;  %2037 = vmatpush1.bf16.msra.mxu1 %v2111_v18 }
  0x74   : > { %860 = vmatmul.mubr.bf16.vlgmr.msra.gmra.mrb[0].mxu0 %v2112_v19  ;;  %988 = vmatmul.mubr.bf16.vlgmr.msra.gmra.mrb[0].mxu1 %v2115_v20  ;;  %v2575_v19 = vld [vmem:[%s2859_s3] ss:$0 sm:$0xff] }
  0x75   : > { %867 = vmatprep.mubr.bf16.mxu0 %v2118_v21  ;;  %995 = vmatprep.mubr.bf16.mxu1 %v2120_v22 }
  0x7c   : > { %868 = vmatmul.mubr.bf16.gmra.mrb[4].mxu0 %v2122_v23  ;;  %996 = vmatmul.mubr.bf16.gmra.mrb[4].mxu1 %v2123_v24 }
  0x7d   : > { %875 = vmatprep.mubr.bf16.mxu0 %v2124_v25  ;;  %1003 = vmatprep.mubr.bf16.mxu1 %v2126_v26 }
  0x84   : > { %876 = vmatmul.mubr.bf16.gmra.mrb[8].mxu0 %v2128_v27  ;;  %1004 = vmatmul.mubr.bf16.gmra.mrb[8].mxu1 %v2129_v28 }
  0x85   : > { %883 = vmatprep.mubr.bf16.mxu0 %v2130_v29  ;;  %1011 = vmatprep.mubr.bf16.mxu1 %v2132_v30 }
  0x8c   : > { %884 = vmatmul.mubr.bf16.gmra.mrb[12].mxu0 %v2134_v31  ;;  %1012 = vmatmul.mubr.bf16.gmra.mrb[12].mxu1 %v2135_v32 }
  0x8d   : > { %891 = vmatprep.mubr.bf16.mxu0 %v2136_v33  ;;  %1019 = vmatprep.mubr.bf16.mxu1 %v2138_v34 }
  0x94   : > { %892 = vmatmul.mubr.bf16.gmra.mrb[16].mxu0 %v2140_v35  ;;  %1020 = vmatmul.mubr.bf16.gmra.mrb[16].mxu1 %v2141_v36 }
  0x95   : > { %899 = vmatprep.mubr.bf16.mxu0 %v2142_v37  ;;  %1027 = vmatprep.mubr.bf16.mxu1 %v2144_v38 }
  0x9c   : > { %900 = vmatmul.mubr.bf16.gmra.mrb[20].mxu0 %v2146_v39  ;;  %1028 = vmatmul.mubr.bf16.gmra.mrb[20].mxu1 %v2147_v40 }
  0x9d   : > { %907 = vmatprep.mubr.bf16.mxu0 %v2148_v41  ;;  %1035 = vmatprep.mubr.bf16.mxu1 %v2150_v42 }
  0xa4   : > { %908 = vmatmul.mubr.bf16.gmra.mrb[24].mxu0 %v2152_v43  ;;  %1036 = vmatmul.mubr.bf16.gmra.mrb[24].mxu1 %v2153_v44 }
  0xa5   : > { %915 = vmatprep.mubr.bf16.mxu0 %v2154_v45  ;;  %1043 = vmatprep.mubr.bf16.mxu1 %v2156_v46 }
  0xac   : > { %916 = vmatmul.mubr.bf16.gmra.mrb[28].mxu0 %v2158_v47  ;;  %1044 = vmatmul.mubr.bf16.gmra.mrb[28].mxu1 %v2159_v48 }
  0xad   : > { %923 = vmatprep.mubr.bf16.mxu0 %v2160_v49  ;;  %1051 = vmatprep.mubr.bf16.mxu1 %v2162_v50 }
  0xb4   : > { %924 = vmatmul.mubr.bf16.gmra.mrb[32].mxu0 %v2164_v51  ;;  %1052 = vmatmul.mubr.bf16.gmra.mrb[32].mxu1 %v2165_v52 }
  0xb5   : > { %931 = vmatprep.mubr.bf16.mxu0 %v2166_v53  ;;  %1059 = vmatprep.mubr.bf16.mxu1 %v2168_v54 }
  0xbc   : > { %932 = vmatmul.mubr.bf16.gmra.mrb[36].mxu0 %v2170_v55  ;;  %1060 = vmatmul.mubr.bf16.gmra.mrb[36].mxu1 %v2171_v56 }
  0xbd   : > { %939 = vmatprep.mubr.bf16.mxu0 %v2172_v57  ;;  %1067 = vmatprep.mubr.bf16.mxu1 %v2174_v58 }
  0xc4   : > { %940 = vmatmul.mubr.bf16.gmra.mrb[40].mxu0 %v2176_v59  ;;  %1068 = vmatmul.mubr.bf16.gmra.mrb[40].mxu1 %v2177_v60 }
  0xc5   : > { %947 = vmatprep.mubr.bf16.mxu0 %v2178_v61  ;;  %1075 = vmatprep.mubr.bf16.mxu1 %v2180_v62 }
  0xcc   : > { %948 = vmatmul.mubr.bf16.gmra.mrb[44].mxu0 %v2182_v63  ;;  %1076 = vmatmul.mubr.bf16.gmra.mrb[44].mxu1 %v2183_v0 }
  0xcd   : > { %955 = vmatprep.mubr.bf16.mxu0 %v2184_v1  ;;  %1083 = vmatprep.mubr.bf16.mxu1 %v2186_v2 }
  0xd4   : > { %956 = vmatmul.mubr.bf16.gmra.mrb[48].mxu0 %v2188_v3  ;;  %1084 = vmatmul.mubr.bf16.gmra.mrb[48].mxu1 %v2189_v4 }
  0xd5   : > { %963 = vmatprep.mubr.bf16.mxu0 %v2190_v5  ;;  %1091 = vmatprep.mubr.bf16.mxu1 %v2192_v6 }
  0xdc   : > { %964 = vmatmul.mubr.bf16.gmra.mrb[52].mxu0 %v2194_v7  ;;  %1092 = vmatmul.mubr.bf16.gmra.mrb[52].mxu1 %v2195_v8 }
  0xdd   : > { %971 = vmatprep.mubr.bf16.mxu0 %v2196_v9  ;;  %1099 = vmatprep.mubr.bf16.mxu1 %v2198_v10 }
  0xe4   : > { %972 = vmatmul.mubr.bf16.gmra.mrb[56].mxu0 %v2200_v11  ;;  %1100 = vmatmul.mubr.bf16.gmra.mrb[56].mxu1 %v2201_v12 }
  0xe5   : > { %979 = vmatprep.mubr.bf16.mxu0 %v2202_v13  ;;  %1107 = vmatprep.mubr.bf16.mxu1 %v2204_v14 }
  0xec   : > { %980 = vmatmul.mubr.bf16.gmra.mrb[60].mxu0 %v2206_v15  ;;  %1108 = vmatmul.mubr.bf16.gmra.mrb[60].mxu1 %v2207_v16 }
 0x147   : > { %v861_v18 = vpop.f32.mrb[0].mxu0  ;;  %v989_v20 = vpop.f32.mrb[0].mxu1 }
 0x148   : > { %v1123_v21 = vmul.f32 %v2570_v17, %v861_v18  ;;  %v1155_v22 = vmul.f32 %v2570_v17, %v989_v20  ;;  %v863_v23 = vpop.f32.mrb[1].mxu0  ;;  %v991_v24 = vpop.f32.mrb[1].mxu1 }
 0x149   : > { %v864_v25 = vpop.f32.mrb[2].mxu0  ;;  %v992_v26 = vpop.f32.mrb[2].mxu1 }
 0x14a   : > { %v1194_v27 = vadd.f32 %v2575_v19, %v1123_v21  ;;  %v1226_v28 = vadd.f32 %v2575_v19, %v1155_v22  ;;  %v1124_v29 = vmul.f32 %v2570_v17, %v864_v25  ;;  %v1156_v30 = vmul.f32 %v2570_v17, %v992_v26  ;;  %v866_v31 = vpop.f32.mrb[3].mxu0  ;;  %v994_v32 = vpop.f32.mrb[3].mxu1 }
 0x14c   : > { %v1258_v33 = vmax.f32 %v1194_v27, 0.0  ;;  %v1290_v34 = vmax.f32 %v1226_v28, 0.0  ;;  %v1195_v35 = vadd.f32 %v2575_v19, %v1124_v29  ;;  %v1227_v36 = vadd.f32 %v2575_v19, %v1156_v30 }
 0x14e   : > { %v1942_v37 = vpack.c.bf16 %v1258_v33, %v1258_v33  ;;  %v1974_v38 = vpack.c.bf16 %v1290_v34, %v1290_v34  ;;  %v1259_v39 = vmax.f32 %v1195_v35, 0.0  ;;  %v1291_v40 = vmax.f32 %v1227_v36, 0.0 }
 0x14f   : > { %v869_v41 = vpop.f32.mrb[4].mxu0  ;;  %v997_v42 = vpop.f32.mrb[4].mxu1 }
 0x150   : > { %1579 = vst.msk [vmem:[%s2588_s10] sm:$0xf] %vm1578_vm0, %v1942_v37  ;;  %1611 = vst.msk [vmem:[%s2588_s10 + $0x80] sm:$0xf] %vm1578_vm0, %v1974_v38  ;;  %v1943_v43 = vpack.c.bf16 %v1259_v39, %v1259_v39  ;;  %v1975_v44 = vpack.c.bf16 %v1291_v40, %v1291_v40  ;;  %v1125_v45 = vmul.f32 %v2570_v17, %v869_v41  ;;  %v871_v47 = vpop.f32.mrb[5].mxu0  ;;  %v999_v48 = vpop.f32.mrb[5].mxu1 }
 0x151   : > { %v1157_v46 = vmul.f32 %v2570_v17, %v997_v42  ;;  %v872_v49 = vpop.f32.mrb[6].mxu0  ;;  %v1000_v50 = vpop.f32.mrb[6].mxu1 }
 0x152   : > { %1580 = vst.msk [vmem:[%s2588_s10 + $0x4] sm:$0xf] %vm1578_vm0, %v1943_v43  ;;  %1612 = vst.msk [vmem:[%s2588_s10 + $0x84] sm:$0xf] %vm1578_vm0, %v1975_v44  ;;  %v1196_v51 = vadd.f32 %v2575_v19, %v1125_v45  ;;  %v1126_v53 = vmul.f32 %v2570_v17, %v872_v49  ;;  %v1158_v54 = vmul.f32 %v2570_v17, %v1000_v50  ;;  %v874_v55 = vpop.f32.mrb[7].mxu0  ;;  %v1002_v56 = vpop.f32.mrb[7].mxu1 }
 0x153   : > { %v1228_v52 = vadd.f32 %v2575_v19, %v1157_v46 }
 0x154   : > { %v1260_v57 = vmax.f32 %v1196_v51, 0.0  ;;  %v1197_v59 = vadd.f32 %v2575_v19, %v1126_v53  ;;  %v1229_v60 = vadd.f32 %v2575_v19, %v1158_v54 }
 0x155   : > { %v1292_v58 = vmax.f32 %v1228_v52, 0.0 }
 0x156   : > { %v1944_v61 = vpack.c.bf16 %v1260_v57, %v1260_v57  ;;  %v1261_v63 = vmax.f32 %v1197_v59, 0.0  ;;  %v1293_v0 = vmax.f32 %v1229_v60, 0.0 }
 0x157   : > { %v1976_v62 = vpack.c.bf16 %v1292_v58, %v1292_v58  ;;  %v877_v1 = vpop.f32.mrb[8].mxu0  ;;  %v1005_v2 = vpop.f32.mrb[8].mxu1 }
 0x158   : > { %1581 = vst.msk [vmem:[%s2588_s10 + $0x8] sm:$0xf] %vm1578_vm0, %v1944_v61  ;;  %v1945_v3 = vpack.c.bf16 %v1261_v63, %v1261_v63  ;;  %v1977_v4 = vpack.c.bf16 %v1293_v0, %v1293_v0  ;;  %v1127_v5 = vmul.f32 %v2570_v17, %v877_v1  ;;  %v1159_v6 = vmul.f32 %v2570_v17, %v1005_v2  ;;  %v879_v7 = vpop.f32.mrb[9].mxu0  ;;  %v1007_v8 = vpop.f32.mrb[9].mxu1 }
 0x159   : > { %1613 = vst.msk [vmem:[%s2588_s10 + $0x88] sm:$0xf] %vm1578_vm0, %v1976_v62  ;;  %v880_v9 = vpop.f32.mrb[10].mxu0  ;;  %v1008_v10 = vpop.f32.mrb[10].mxu1 }
 0x15a   : > { %1582 = vst.msk [vmem:[%s2588_s10 + $0xc] sm:$0xf] %vm1578_vm0, %v1945_v3  ;;  %1614 = vst.msk [vmem:[%s2588_s10 + $0x8c] sm:$0xf] %vm1578_vm0, %v1977_v4  ;;  %v1198_v11 = vadd.f32 %v2575_v19, %v1127_v5  ;;  %v1230_v12 = vadd.f32 %v2575_v19, %v1159_v6  ;;  %v1128_v13 = vmul.f32 %v2570_v17, %v880_v9  ;;  %v882_v15 = vpop.f32.mrb[11].mxu0  ;;  %v1010_v16 = vpop.f32.mrb[11].mxu1 }
 0x15b   : > { %v1160_v14 = vmul.f32 %v2570_v17, %v1008_v10 }
 0x15c   : > { %v1262_v18 = vmax.f32 %v1198_v11, 0.0  ;;  %v1294_v20 = vmax.f32 %v1230_v12, 0.0  ;;  %v1199_v21 = vadd.f32 %v2575_v19, %v1128_v13 }
 0x15d   : > { %v1231_v22 = vadd.f32 %v2575_v19, %v1160_v14 }
 0x15e   : > { %v1946_v23 = vpack.c.bf16 %v1262_v18, %v1262_v18  ;;  %v1978_v24 = vpack.c.bf16 %v1294_v20, %v1294_v20  ;;  %v1263_v25 = vmax.f32 %v1199_v21, 0.0 }
 0x15f   : > { %v1295_v26 = vmax.f32 %v1231_v22, 0.0  ;;  %v885_v27 = vpop.f32.mrb[12].mxu0  ;;  %v1013_v28 = vpop.f32.mrb[12].mxu1 }
 0x160   : > { %1583 = vst.msk [vmem:[%s2588_s10 + $0x10] sm:$0xf] %vm1578_vm0, %v1946_v23  ;;  %1615 = vst.msk [vmem:[%s2588_s10 + $0x90] sm:$0xf] %vm1578_vm0, %v1978_v24  ;;  %v1947_v29 = vpack.c.bf16 %v1263_v25, %v1263_v25  ;;  %v1129_v31 = vmul.f32 %v2570_v17, %v885_v27  ;;  %v1161_v32 = vmul.f32 %v2570_v17, %v1013_v28  ;;  %v887_v33 = vpop.f32.mrb[13].mxu0  ;;  %v1015_v34 = vpop.f32.mrb[13].mxu1 }
 0x161   : > { %v1979_v30 = vpack.c.bf16 %v1295_v26, %v1295_v26  ;;  %v888_v35 = vpop.f32.mrb[14].mxu0  ;;  %v1016_v36 = vpop.f32.mrb[14].mxu1 }
 0x162   : > { %1584 = vst.msk [vmem:[%s2588_s10 + $0x14] sm:$0xf] %vm1578_vm0, %v1947_v29  ;;  %v1200_v37 = vadd.f32 %v2575_v19, %v1129_v31  ;;  %v1232_v38 = vadd.f32 %v2575_v19, %v1161_v32  ;;  %v1130_v39 = vmul.f32 %v2570_v17, %v888_v35  ;;  %v1162_v40 = vmul.f32 %v2570_v17, %v1016_v36  ;;  %v890_v41 = vpop.f32.mrb[15].mxu0  ;;  %v1018_v42 = vpop.f32.mrb[15].mxu1 }
 0x163   : > { %1616 = vst.msk [vmem:[%s2588_s10 + $0x94] sm:$0xf] %vm1578_vm0, %v1979_v30 }
 0x164   : > { %v1264_v43 = vmax.f32 %v1200_v37, 0.0  ;;  %v1296_v44 = vmax.f32 %v1232_v38, 0.0  ;;  %v1201_v45 = vadd.f32 %v2575_v19, %v1130_v39  ;;  %v1233_v46 = vadd.f32 %v2575_v19, %v1162_v40 }
 0x166   : > { %v1948_v47 = vpack.c.bf16 %v1264_v43, %v1264_v43  ;;  %v1980_v48 = vpack.c.bf16 %v1296_v44, %v1296_v44  ;;  %v1265_v49 = vmax.f32 %v1201_v45, 0.0  ;;  %v1297_v50 = vmax.f32 %v1233_v46, 0.0 }
 0x167   : > { %v893_v51 = vpop.f32.mrb[16].mxu0  ;;  %v1021_v52 = vpop.f32.mrb[16].mxu1 }
 0x168   : > { %1585 = vst.msk [vmem:[%s2588_s10 + $0x18] sm:$0xf] %vm1578_vm0, %v1948_v47  ;;  %1617 = vst.msk [vmem:[%s2588_s10 + $0x98] sm:$0xf] %vm1578_vm0, %v1980_v48  ;;  %v1949_v53 = vpack.c.bf16 %v1265_v49, %v1265_v49  ;;  %v1981_v54 = vpack.c.bf16 %v1297_v50, %v1297_v50  ;;  %v1131_v55 = vmul.f32 %v2570_v17, %v893_v51  ;;  %v895_v57 = vpop.f32.mrb[17].mxu0  ;;  %v1023_v58 = vpop.f32.mrb[17].mxu1 }
 0x169   : > { %v1163_v56 = vmul.f32 %v2570_v17, %v1021_v52  ;;  %v896_v59 = vpop.f32.mrb[18].mxu0  ;;  %v1024_v60 = vpop.f32.mrb[18].mxu1 }
 0x16a   : > { %1586 = vst.msk [vmem:[%s2588_s10 + $0x1c] sm:$0xf] %vm1578_vm0, %v1949_v53  ;;  %1618 = vst.msk [vmem:[%s2588_s10 + $0x9c] sm:$0xf] %vm1578_vm0, %v1981_v54  ;;  %v1202_v61 = vadd.f32 %v2575_v19, %v1131_v55  ;;  %v1132_v63 = vmul.f32 %v2570_v17, %v896_v59  ;;  %v1164_v0 = vmul.f32 %v2570_v17, %v1024_v60  ;;  %v898_v1 = vpop.f32.mrb[19].mxu0  ;;  %v1026_v2 = vpop.f32.mrb[19].mxu1 }
 0x16b   : > { %v1234_v62 = vadd.f32 %v2575_v19, %v1163_v56 }
 0x16c   : > { %v1266_v3 = vmax.f32 %v1202_v61, 0.0  ;;  %v1203_v5 = vadd.f32 %v2575_v19, %v1132_v63  ;;  %v1235_v6 = vadd.f32 %v2575_v19, %v1164_v0 }
 0x16d   : > { %v1298_v4 = vmax.f32 %v1234_v62, 0.0 }
 0x16e   : > { %v1950_v7 = vpack.c.bf16 %v1266_v3, %v1266_v3  ;;  %v1267_v9 = vmax.f32 %v1203_v5, 0.0  ;;  %v1299_v10 = vmax.f32 %v1235_v6, 0.0 }
 0x16f   : > { %v1982_v8 = vpack.c.bf16 %v1298_v4, %v1298_v4  ;;  %v901_v11 = vpop.f32.mrb[20].mxu0  ;;  %v1029_v12 = vpop.f32.mrb[20].mxu1 }
 0x170   : > { %1587 = vst.msk [vmem:[%s2588_s10 + $0x20] sm:$0xf] %vm1578_vm0, %v1950_v7  ;;  %v1951_v13 = vpack.c.bf16 %v1267_v9, %v1267_v9  ;;  %v1983_v14 = vpack.c.bf16 %v1299_v10, %v1299_v10  ;;  %v1133_v15 = vmul.f32 %v2570_v17, %v901_v11  ;;  %v1165_v16 = vmul.f32 %v2570_v17, %v1029_v12  ;;  %v903_v18 = vpop.f32.mrb[21].mxu0  ;;  %v1031_v20 = vpop.f32.mrb[21].mxu1 }
 0x171   : > { %1619 = vst.msk [vmem:[%s2588_s10 + $0xa0] sm:$0xf] %vm1578_vm0, %v1982_v8  ;;  %v904_v21 = vpop.f32.mrb[22].mxu0  ;;  %v1032_v22 = vpop.f32.mrb[22].mxu1 }
 0x172   : > { %1588 = vst.msk [vmem:[%s2588_s10 + $0x24] sm:$0xf] %vm1578_vm0, %v1951_v13  ;;  %1620 = vst.msk [vmem:[%s2588_s10 + $0xa4] sm:$0xf] %vm1578_vm0, %v1983_v14  ;;  %v1204_v23 = vadd.f32 %v2575_v19, %v1133_v15  ;;  %v1236_v24 = vadd.f32 %v2575_v19, %v1165_v16  ;;  %v1134_v25 = vmul.f32 %v2570_v17, %v904_v21  ;;  %v906_v27 = vpop.f32.mrb[23].mxu0  ;;  %v1034_v28 = vpop.f32.mrb[23].mxu1 }
 0x173   : > { %v1166_v26 = vmul.f32 %v2570_v17, %v1032_v22 }
 0x174   : > { %v1268_v29 = vmax.f32 %v1204_v23, 0.0  ;;  %v1300_v30 = vmax.f32 %v1236_v24, 0.0  ;;  %v1205_v31 = vadd.f32 %v2575_v19, %v1134_v25 }
 0x175   : > { %v1237_v32 = vadd.f32 %v2575_v19, %v1166_v26 }
 0x176   : > { %v1952_v33 = vpack.c.bf16 %v1268_v29, %v1268_v29  ;;  %v1984_v34 = vpack.c.bf16 %v1300_v30, %v1300_v30  ;;  %v1269_v35 = vmax.f32 %v1205_v31, 0.0 }
 0x177   : > { %v1301_v36 = vmax.f32 %v1237_v32, 0.0  ;;  %v909_v37 = vpop.f32.mrb[24].mxu0  ;;  %v1037_v38 = vpop.f32.mrb[24].mxu1 }
 0x178   : > { %1589 = vst.msk [vmem:[%s2588_s10 + $0x28] sm:$0xf] %vm1578_vm0, %v1952_v33  ;;  %1621 = vst.msk [vmem:[%s2588_s10 + $0xa8] sm:$0xf] %vm1578_vm0, %v1984_v34  ;;  %v1953_v39 = vpack.c.bf16 %v1269_v35, %v1269_v35  ;;  %v1135_v41 = vmul.f32 %v2570_v17, %v909_v37  ;;  %v1167_v42 = vmul.f32 %v2570_v17, %v1037_v38  ;;  %v911_v43 = vpop.f32.mrb[25].mxu0  ;;  %v1039_v44 = vpop.f32.mrb[25].mxu1 }
 0x179   : > { %v1985_v40 = vpack.c.bf16 %v1301_v36, %v1301_v36  ;;  %v912_v45 = vpop.f32.mrb[26].mxu0  ;;  %v1040_v46 = vpop.f32.mrb[26].mxu1 }
 0x17a   : > { %1590 = vst.msk [vmem:[%s2588_s10 + $0x2c] sm:$0xf] %vm1578_vm0, %v1953_v39  ;;  %v1206_v47 = vadd.f32 %v2575_v19, %v1135_v41  ;;  %v1238_v48 = vadd.f32 %v2575_v19, %v1167_v42  ;;  %v1136_v49 = vmul.f32 %v2570_v17, %v912_v45  ;;  %v1168_v50 = vmul.f32 %v2570_v17, %v1040_v46  ;;  %v914_v51 = vpop.f32.mrb[27].mxu0  ;;  %v1042_v52 = vpop.f32.mrb[27].mxu1 }
 0x17b   : > { %1622 = vst.msk [vmem:[%s2588_s10 + $0xac] sm:$0xf] %vm1578_vm0, %v1985_v40 }
 0x17c   : > { %v1270_v53 = vmax.f32 %v1206_v47, 0.0  ;;  %v1302_v54 = vmax.f32 %v1238_v48, 0.0  ;;  %v1207_v55 = vadd.f32 %v2575_v19, %v1136_v49  ;;  %v1239_v56 = vadd.f32 %v2575_v19, %v1168_v50 }
 0x17e   : > { %v1954_v57 = vpack.c.bf16 %v1270_v53, %v1270_v53  ;;  %v1986_v58 = vpack.c.bf16 %v1302_v54, %v1302_v54  ;;  %v1271_v59 = vmax.f32 %v1207_v55, 0.0  ;;  %v1303_v60 = vmax.f32 %v1239_v56, 0.0 }
 0x17f   : > { %v917_v61 = vpop.f32.mrb[28].mxu0  ;;  %v1045_v62 = vpop.f32.mrb[28].mxu1 }
 0x180   : > { %1591 = vst.msk [vmem:[%s2588_s10 + $0x30] sm:$0xf] %vm1578_vm0, %v1954_v57  ;;  %1623 = vst.msk [vmem:[%s2588_s10 + $0xb0] sm:$0xf] %vm1578_vm0, %v1986_v58  ;;  %v1955_v63 = vpack.c.bf16 %v1271_v59, %v1271_v59  ;;  %v1987_v0 = vpack.c.bf16 %v1303_v60, %v1303_v60  ;;  %v1137_v1 = vmul.f32 %v2570_v17, %v917_v61  ;;  %v919_v3 = vpop.f32.mrb[29].mxu0  ;;  %v1047_v4 = vpop.f32.mrb[29].mxu1 }
 0x181   : > { %v1169_v2 = vmul.f32 %v2570_v17, %v1045_v62  ;;  %v920_v5 = vpop.f32.mrb[30].mxu0  ;;  %v1048_v6 = vpop.f32.mrb[30].mxu1 }
 0x182   : > { %1592 = vst.msk [vmem:[%s2588_s10 + $0x34] sm:$0xf] %vm1578_vm0, %v1955_v63  ;;  %1624 = vst.msk [vmem:[%s2588_s10 + $0xb4] sm:$0xf] %vm1578_vm0, %v1987_v0  ;;  %v1208_v7 = vadd.f32 %v2575_v19, %v1137_v1  ;;  %v1138_v9 = vmul.f32 %v2570_v17, %v920_v5  ;;  %v1170_v10 = vmul.f32 %v2570_v17, %v1048_v6  ;;  %v922_v11 = vpop.f32.mrb[31].mxu0  ;;  %v1050_v12 = vpop.f32.mrb[31].mxu1 }
 0x183   : > { %v1240_v8 = vadd.f32 %v2575_v19, %v1169_v2 }
 0x184   : > { %v1272_v13 = vmax.f32 %v1208_v7, 0.0  ;;  %v1209_v15 = vadd.f32 %v2575_v19, %v1138_v9  ;;  %v1241_v16 = vadd.f32 %v2575_v19, %v1170_v10 }
 0x185   : > { %v1304_v14 = vmax.f32 %v1240_v8, 0.0 }
 0x186   : > { %v1956_v18 = vpack.c.bf16 %v1272_v13, %v1272_v13  ;;  %v1273_v21 = vmax.f32 %v1209_v15, 0.0  ;;  %v1305_v22 = vmax.f32 %v1241_v16, 0.0 }
 0x187   : > { %v1988_v20 = vpack.c.bf16 %v1304_v14, %v1304_v14  ;;  %v925_v23 = vpop.f32.mrb[32].mxu0  ;;  %v1053_v24 = vpop.f32.mrb[32].mxu1 }
 0x188   : > { %1593 = vst.msk [vmem:[%s2588_s10 + $0x38] sm:$0xf] %vm1578_vm0, %v1956_v18  ;;  %v1957_v25 = vpack.c.bf16 %v1273_v21, %v1273_v21  ;;  %v1989_v26 = vpack.c.bf16 %v1305_v22, %v1305_v22  ;;  %v1139_v27 = vmul.f32 %v2570_v17, %v925_v23  ;;  %v1171_v28 = vmul.f32 %v2570_v17, %v1053_v24  ;;  %v927_v29 = vpop.f32.mrb[33].mxu0  ;;  %v1055_v30 = vpop.f32.mrb[33].mxu1 }
 0x189   : > { %1625 = vst.msk [vmem:[%s2588_s10 + $0xb8] sm:$0xf] %vm1578_vm0, %v1988_v20  ;;  %v928_v31 = vpop.f32.mrb[34].mxu0  ;;  %v1056_v32 = vpop.f32.mrb[34].mxu1 }
 0x18a   : > { %1594 = vst.msk [vmem:[%s2588_s10 + $0x3c] sm:$0xf] %vm1578_vm0, %v1957_v25  ;;  %1626 = vst.msk [vmem:[%s2588_s10 + $0xbc] sm:$0xf] %vm1578_vm0, %v1989_v26  ;;  %v1210_v33 = vadd.f32 %v2575_v19, %v1139_v27  ;;  %v1242_v34 = vadd.f32 %v2575_v19, %v1171_v28  ;;  %v1140_v35 = vmul.f32 %v2570_v17, %v928_v31  ;;  %v930_v37 = vpop.f32.mrb[35].mxu0  ;;  %v1058_v38 = vpop.f32.mrb[35].mxu1 }
 0x18b   : > { %v1172_v36 = vmul.f32 %v2570_v17, %v1056_v32 }
 0x18c   : > { %v1274_v39 = vmax.f32 %v1210_v33, 0.0  ;;  %v1306_v40 = vmax.f32 %v1242_v34, 0.0  ;;  %v1211_v41 = vadd.f32 %v2575_v19, %v1140_v35 }
 0x18d   : > { %v1243_v42 = vadd.f32 %v2575_v19, %v1172_v36 }
 0x18e   : > { %v1958_v43 = vpack.c.bf16 %v1274_v39, %v1274_v39  ;;  %v1990_v44 = vpack.c.bf16 %v1306_v40, %v1306_v40  ;;  %v1275_v45 = vmax.f32 %v1211_v41, 0.0 }
 0x18f   : > { %v1307_v46 = vmax.f32 %v1243_v42, 0.0  ;;  %v933_v47 = vpop.f32.mrb[36].mxu0  ;;  %v1061_v48 = vpop.f32.mrb[36].mxu1 }
 0x190   : > { %1595 = vst.msk [vmem:[%s2588_s10 + $0x40] sm:$0xf] %vm1578_vm0, %v1958_v43  ;;  %1627 = vst.msk [vmem:[%s2588_s10 + $0xc0] sm:$0xf] %vm1578_vm0, %v1990_v44  ;;  %v1959_v49 = vpack.c.bf16 %v1275_v45, %v1275_v45  ;;  %v1141_v51 = vmul.f32 %v2570_v17, %v933_v47  ;;  %v1173_v52 = vmul.f32 %v2570_v17, %v1061_v48  ;;  %v935_v53 = vpop.f32.mrb[37].mxu0  ;;  %v1063_v54 = vpop.f32.mrb[37].mxu1 }
 0x191   : > { %v1991_v50 = vpack.c.bf16 %v1307_v46, %v1307_v46  ;;  %v936_v55 = vpop.f32.mrb[38].mxu0  ;;  %v1064_v56 = vpop.f32.mrb[38].mxu1 }
 0x192   : > { %1596 = vst.msk [vmem:[%s2588_s10 + $0x44] sm:$0xf] %vm1578_vm0, %v1959_v49  ;;  %v1212_v57 = vadd.f32 %v2575_v19, %v1141_v51  ;;  %v1244_v58 = vadd.f32 %v2575_v19, %v1173_v52  ;;  %v1142_v59 = vmul.f32 %v2570_v17, %v936_v55  ;;  %v1174_v60 = vmul.f32 %v2570_v17, %v1064_v56  ;;  %v938_v61 = vpop.f32.mrb[39].mxu0  ;;  %v1066_v62 = vpop.f32.mrb[39].mxu1 }
 0x193   : > { %1628 = vst.msk [vmem:[%s2588_s10 + $0xc4] sm:$0xf] %vm1578_vm0, %v1991_v50 }
 0x194   : > { %v1276_v63 = vmax.f32 %v1212_v57, 0.0  ;;  %v1308_v0 = vmax.f32 %v1244_v58, 0.0  ;;  %v1213_v1 = vadd.f32 %v2575_v19, %v1142_v59  ;;  %v1245_v2 = vadd.f32 %v2575_v19, %v1174_v60 }
 0x196   : > { %v1960_v3 = vpack.c.bf16 %v1276_v63, %v1276_v63  ;;  %v1992_v4 = vpack.c.bf16 %v1308_v0, %v1308_v0  ;;  %v1277_v5 = vmax.f32 %v1213_v1, 0.0  ;;  %v1309_v6 = vmax.f32 %v1245_v2, 0.0 }
 0x197   : > { %v941_v7 = vpop.f32.mrb[40].mxu0  ;;  %v1069_v8 = vpop.f32.mrb[40].mxu1 }
 0x198   : > { %1597 = vst.msk [vmem:[%s2588_s10 + $0x48] sm:$0xf] %vm1578_vm0, %v1960_v3  ;;  %1629 = vst.msk [vmem:[%s2588_s10 + $0xc8] sm:$0xf] %vm1578_vm0, %v1992_v4  ;;  %v1961_v9 = vpack.c.bf16 %v1277_v5, %v1277_v5  ;;  %v1993_v10 = vpack.c.bf16 %v1309_v6, %v1309_v6  ;;  %v1143_v11 = vmul.f32 %v2570_v17, %v941_v7  ;;  %v943_v13 = vpop.f32.mrb[41].mxu0  ;;  %v1071_v14 = vpop.f32.mrb[41].mxu1 }
 0x199   : > { %v1175_v12 = vmul.f32 %v2570_v17, %v1069_v8  ;;  %v944_v15 = vpop.f32.mrb[42].mxu0  ;;  %v1072_v16 = vpop.f32.mrb[42].mxu1 }
 0x19a   : > { %1598 = vst.msk [vmem:[%s2588_s10 + $0x4c] sm:$0xf] %vm1578_vm0, %v1961_v9  ;;  %1630 = vst.msk [vmem:[%s2588_s10 + $0xcc] sm:$0xf] %vm1578_vm0, %v1993_v10  ;;  %v1214_v18 = vadd.f32 %v2575_v19, %v1143_v11  ;;  %v1144_v21 = vmul.f32 %v2570_v17, %v944_v15  ;;  %v1176_v22 = vmul.f32 %v2570_v17, %v1072_v16  ;;  %v946_v23 = vpop.f32.mrb[43].mxu0  ;;  %v1074_v24 = vpop.f32.mrb[43].mxu1 }
 0x19b   : > { %v1246_v20 = vadd.f32 %v2575_v19, %v1175_v12 }
 0x19c   : > { %v1278_v25 = vmax.f32 %v1214_v18, 0.0  ;;  %v1215_v27 = vadd.f32 %v2575_v19, %v1144_v21  ;;  %v1247_v28 = vadd.f32 %v2575_v19, %v1176_v22 }
 0x19d   : > { %v1310_v26 = vmax.f32 %v1246_v20, 0.0 }
 0x19e   : > { %v1962_v29 = vpack.c.bf16 %v1278_v25, %v1278_v25  ;;  %v1279_v31 = vmax.f32 %v1215_v27, 0.0  ;;  %v1311_v32 = vmax.f32 %v1247_v28, 0.0 }
 0x19f   : > { %v1994_v30 = vpack.c.bf16 %v1310_v26, %v1310_v26  ;;  %v949_v33 = vpop.f32.mrb[44].mxu0  ;;  %v1077_v34 = vpop.f32.mrb[44].mxu1 }
 0x1a0   : > { %1599 = vst.msk [vmem:[%s2588_s10 + $0x50] sm:$0xf] %vm1578_vm0, %v1962_v29  ;;  %v1963_v35 = vpack.c.bf16 %v1279_v31, %v1279_v31  ;;  %v1995_v36 = vpack.c.bf16 %v1311_v32, %v1311_v32  ;;  %v1145_v37 = vmul.f32 %v2570_v17, %v949_v33  ;;  %v1177_v38 = vmul.f32 %v2570_v17, %v1077_v34  ;;  %v951_v39 = vpop.f32.mrb[45].mxu0  ;;  %v1079_v40 = vpop.f32.mrb[45].mxu1 }
 0x1a1   : > { %1631 = vst.msk [vmem:[%s2588_s10 + $0xd0] sm:$0xf] %vm1578_vm0, %v1994_v30  ;;  %v952_v41 = vpop.f32.mrb[46].mxu0  ;;  %v1080_v42 = vpop.f32.mrb[46].mxu1 }
 0x1a2   : > { %1600 = vst.msk [vmem:[%s2588_s10 + $0x54] sm:$0xf] %vm1578_vm0, %v1963_v35  ;;  %1632 = vst.msk [vmem:[%s2588_s10 + $0xd4] sm:$0xf] %vm1578_vm0, %v1995_v36  ;;  %v1216_v43 = vadd.f32 %v2575_v19, %v1145_v37  ;;  %v1248_v44 = vadd.f32 %v2575_v19, %v1177_v38  ;;  %v1146_v45 = vmul.f32 %v2570_v17, %v952_v41  ;;  %v954_v47 = vpop.f32.mrb[47].mxu0  ;;  %v1082_v48 = vpop.f32.mrb[47].mxu1 }
 0x1a3   : > { %v1178_v46 = vmul.f32 %v2570_v17, %v1080_v42 }
 0x1a4   : > { %v1280_v49 = vmax.f32 %v1216_v43, 0.0  ;;  %v1312_v50 = vmax.f32 %v1248_v44, 0.0  ;;  %v1217_v51 = vadd.f32 %v2575_v19, %v1146_v45 }
 0x1a5   : > { %v1249_v52 = vadd.f32 %v2575_v19, %v1178_v46 }
 0x1a6   : > { %v1964_v53 = vpack.c.bf16 %v1280_v49, %v1280_v49  ;;  %v1996_v54 = vpack.c.bf16 %v1312_v50, %v1312_v50  ;;  %v1281_v55 = vmax.f32 %v1217_v51, 0.0 }
 0x1a7   : > { %v1313_v56 = vmax.f32 %v1249_v52, 0.0  ;;  %v957_v57 = vpop.f32.mrb[48].mxu0  ;;  %v1085_v58 = vpop.f32.mrb[48].mxu1 }
 0x1a8   : > { %1601 = vst.msk [vmem:[%s2588_s10 + $0x58] sm:$0xf] %vm1578_vm0, %v1964_v53  ;;  %1633 = vst.msk [vmem:[%s2588_s10 + $0xd8] sm:$0xf] %vm1578_vm0, %v1996_v54  ;;  %v1965_v59 = vpack.c.bf16 %v1281_v55, %v1281_v55  ;;  %v1147_v61 = vmul.f32 %v2570_v17, %v957_v57  ;;  %v1179_v62 = vmul.f32 %v2570_v17, %v1085_v58  ;;  %v959_v63 = vpop.f32.mrb[49].mxu0  ;;  %v1087_v0 = vpop.f32.mrb[49].mxu1 }
 0x1a9   : > { %v1997_v60 = vpack.c.bf16 %v1313_v56, %v1313_v56  ;;  %v960_v1 = vpop.f32.mrb[50].mxu0  ;;  %v1088_v2 = vpop.f32.mrb[50].mxu1 }
 0x1aa   : > { %1602 = vst.msk [vmem:[%s2588_s10 + $0x5c] sm:$0xf] %vm1578_vm0, %v1965_v59  ;;  %v1218_v3 = vadd.f32 %v2575_v19, %v1147_v61  ;;  %v1250_v4 = vadd.f32 %v2575_v19, %v1179_v62  ;;  %v1148_v5 = vmul.f32 %v2570_v17, %v960_v1  ;;  %v1180_v6 = vmul.f32 %v2570_v17, %v1088_v2  ;;  %v962_v7 = vpop.f32.mrb[51].mxu0  ;;  %v1090_v8 = vpop.f32.mrb[51].mxu1 }
 0x1ab   : > { %1634 = vst.msk [vmem:[%s2588_s10 + $0xdc] sm:$0xf] %vm1578_vm0, %v1997_v60 }
 0x1ac   : > { %v1282_v9 = vmax.f32 %v1218_v3, 0.0  ;;  %v1314_v10 = vmax.f32 %v1250_v4, 0.0  ;;  %v1219_v11 = vadd.f32 %v2575_v19, %v1148_v5  ;;  %v1251_v12 = vadd.f32 %v2575_v19, %v1180_v6 }
 0x1ae   : > { %v1966_v13 = vpack.c.bf16 %v1282_v9, %v1282_v9  ;;  %v1998_v14 = vpack.c.bf16 %v1314_v10, %v1314_v10  ;;  %v1283_v15 = vmax.f32 %v1219_v11, 0.0  ;;  %v1315_v16 = vmax.f32 %v1251_v12, 0.0 }
 0x1af   : > { %v965_v18 = vpop.f32.mrb[52].mxu0  ;;  %v1093_v20 = vpop.f32.mrb[52].mxu1 }
 0x1b0   : > { %1603 = vst.msk [vmem:[%s2588_s10 + $0x60] sm:$0xf] %vm1578_vm0, %v1966_v13  ;;  %1635 = vst.msk [vmem:[%s2588_s10 + $0xe0] sm:$0xf] %vm1578_vm0, %v1998_v14  ;;  %v1967_v21 = vpack.c.bf16 %v1283_v15, %v1283_v15  ;;  %v1999_v22 = vpack.c.bf16 %v1315_v16, %v1315_v16  ;;  %v1149_v23 = vmul.f32 %v2570_v17, %v965_v18  ;;  %v967_v25 = vpop.f32.mrb[53].mxu0  ;;  %v1095_v26 = vpop.f32.mrb[53].mxu1 }
 0x1b1   : > { %v1181_v24 = vmul.f32 %v2570_v17, %v1093_v20  ;;  %v968_v27 = vpop.f32.mrb[54].mxu0  ;;  %v1096_v28 = vpop.f32.mrb[54].mxu1 }
 0x1b2   : > { %1604 = vst.msk [vmem:[%s2588_s10 + $0x64] sm:$0xf] %vm1578_vm0, %v1967_v21  ;;  %1636 = vst.msk [vmem:[%s2588_s10 + $0xe4] sm:$0xf] %vm1578_vm0, %v1999_v22  ;;  %v1220_v29 = vadd.f32 %v2575_v19, %v1149_v23  ;;  %v1150_v31 = vmul.f32 %v2570_v17, %v968_v27  ;;  %v1182_v32 = vmul.f32 %v2570_v17, %v1096_v28  ;;  %v970_v33 = vpop.f32.mrb[55].mxu0  ;;  %v1098_v34 = vpop.f32.mrb[55].mxu1 }
 0x1b3   : > { %v1252_v30 = vadd.f32 %v2575_v19, %v1181_v24 }
 0x1b4   : > { %v1284_v35 = vmax.f32 %v1220_v29, 0.0  ;;  %v1221_v37 = vadd.f32 %v2575_v19, %v1150_v31  ;;  %v1253_v38 = vadd.f32 %v2575_v19, %v1182_v32 }
 0x1b5   : > { %v1316_v36 = vmax.f32 %v1252_v30, 0.0 }
 0x1b6   : > { %v1968_v39 = vpack.c.bf16 %v1284_v35, %v1284_v35  ;;  %v1285_v41 = vmax.f32 %v1221_v37, 0.0  ;;  %v1317_v42 = vmax.f32 %v1253_v38, 0.0 }
 0x1b7   : > { %v2000_v40 = vpack.c.bf16 %v1316_v36, %v1316_v36  ;;  %v973_v43 = vpop.f32.mrb[56].mxu0  ;;  %v1101_v44 = vpop.f32.mrb[56].mxu1 }
 0x1b8   : > { %1605 = vst.msk [vmem:[%s2588_s10 + $0x68] sm:$0xf] %vm1578_vm0, %v1968_v39  ;;  %v1969_v45 = vpack.c.bf16 %v1285_v41, %v1285_v41  ;;  %v2001_v46 = vpack.c.bf16 %v1317_v42, %v1317_v42  ;;  %v1151_v47 = vmul.f32 %v2570_v17, %v973_v43  ;;  %v1183_v48 = vmul.f32 %v2570_v17, %v1101_v44  ;;  %v975_v49 = vpop.f32.mrb[57].mxu0  ;;  %v1103_v50 = vpop.f32.mrb[57].mxu1 }
 0x1b9   : > { %1637 = vst.msk [vmem:[%s2588_s10 + $0xe8] sm:$0xf] %vm1578_vm0, %v2000_v40  ;;  %v976_v51 = vpop.f32.mrb[58].mxu0  ;;  %v1104_v52 = vpop.f32.mrb[58].mxu1 }
 0x1ba   : > { %1606 = vst.msk [vmem:[%s2588_s10 + $0x6c] sm:$0xf] %vm1578_vm0, %v1969_v45  ;;  %1638 = vst.msk [vmem:[%s2588_s10 + $0xec] sm:$0xf] %vm1578_vm0, %v2001_v46  ;;  %v1222_v53 = vadd.f32 %v2575_v19, %v1151_v47  ;;  %v1254_v54 = vadd.f32 %v2575_v19, %v1183_v48  ;;  %v1152_v55 = vmul.f32 %v2570_v17, %v976_v51  ;;  %v978_v57 = vpop.f32.mrb[59].mxu0  ;;  %v1106_v58 = vpop.f32.mrb[59].mxu1 }
 0x1bb   : > { %v1184_v56 = vmul.f32 %v2570_v17, %v1104_v52 }
 0x1bc   : > { %v1286_v59 = vmax.f32 %v1222_v53, 0.0  ;;  %v1318_v60 = vmax.f32 %v1254_v54, 0.0  ;;  %v1223_v61 = vadd.f32 %v2575_v19, %v1152_v55 }
 0x1bd   : > { %v1255_v62 = vadd.f32 %v2575_v19, %v1184_v56 }
 0x1be   : > { %v1970_v63 = vpack.c.bf16 %v1286_v59, %v1286_v59  ;;  %v2002_v0 = vpack.c.bf16 %v1318_v60, %v1318_v60  ;;  %v1287_v1 = vmax.f32 %v1223_v61, 0.0 }
 0x1bf   : > { %v1319_v2 = vmax.f32 %v1255_v62, 0.0  ;;  %v981_v3 = vpop.f32.mrb[60].mxu0  ;;  %v1109_v4 = vpop.f32.mrb[60].mxu1 }
 0x1c0   : > { %1607 = vst.msk [vmem:[%s2588_s10 + $0x70] sm:$0xf] %vm1578_vm0, %v1970_v63  ;;  %1639 = vst.msk [vmem:[%s2588_s10 + $0xf0] sm:$0xf] %vm1578_vm0, %v2002_v0  ;;  %v1971_v5 = vpack.c.bf16 %v1287_v1, %v1287_v1  ;;  %v1153_v7 = vmul.f32 %v2570_v17, %v981_v3  ;;  %v1185_v8 = vmul.f32 %v2570_v17, %v1109_v4  ;;  %v983_v9 = vpop.f32.mrb[61].mxu0  ;;  %v1111_v10 = vpop.f32.mrb[61].mxu1 }
 0x1c1   : > { %v2003_v6 = vpack.c.bf16 %v1319_v2, %v1319_v2  ;;  %v984_v11 = vpop.f32.mrb[62].mxu0  ;;  %v1112_v12 = vpop.f32.mrb[62].mxu1 }
 0x1c2   : > { %1608 = vst.msk [vmem:[%s2588_s10 + $0x74] sm:$0xf] %vm1578_vm0, %v1971_v5  ;;  %v1224_v13 = vadd.f32 %v2575_v19, %v1153_v7  ;;  %v1256_v14 = vadd.f32 %v2575_v19, %v1185_v8  ;;  %v1154_v15 = vmul.f32 %v2570_v17, %v984_v11  ;;  %v1186_v16 = vmul.f32 %v2570_v17, %v1112_v12  ;;  %v986_v18 = vpop.f32.mrb[63].mxu0  ;;  %v1114_v20 = vpop.f32.mrb[63].mxu1 }
 0x1c3   : > { %1640 = vst.msk [vmem:[%s2588_s10 + $0xf4] sm:$0xf] %vm1578_vm0, %v2003_v6 }
 0x1c4   : > { %v1288_v21 = vmax.f32 %v1224_v13, 0.0  ;;  %v1320_v22 = vmax.f32 %v1256_v14, 0.0  ;;  %v1225_v23 = vadd.f32 %v2575_v19, %v1154_v15  ;;  %v1257_v24 = vadd.f32 %v2575_v19, %v1186_v16 }
 0x1c6   : > { %v1972_v25 = vpack.c.bf16 %v1288_v21, %v1288_v21  ;;  %v2004_v26 = vpack.c.bf16 %v1320_v22, %v1320_v22  ;;  %v1289_v27 = vmax.f32 %v1225_v23, 0.0  ;;  %v1321_v28 = vmax.f32 %v1257_v24, 0.0 }
 0x1c8   : > { %1609 = vst.msk [vmem:[%s2588_s10 + $0x78] sm:$0xf] %vm1578_vm0, %v1972_v25  ;;  %1641 = vst.msk [vmem:[%s2588_s10 + $0xf8] sm:$0xf] %vm1578_vm0, %v2004_v26  ;;  %v1973_v29 = vpack.c.bf16 %v1289_v27, %v1289_v27  ;;  %v2005_v30 = vpack.c.bf16 %v1321_v28, %v1321_v28 }
 0x1ca   : > { %1610 = vst.msk [vmem:[%s2588_s10 + $0x7c] sm:$0xf] %vm1578_vm0, %v1973_v29  ;;  %1642 = vst.msk [vmem:[%s2588_s10 + $0xfc] sm:$0xf] %vm1578_vm0, %v2005_v30 }
 0x1cb PF: > { %s17_s20 = sadd.s32 1, %s2288_s20   ;;  %s2864_s15 = smov %s2272_s16 }
 0x1cc   : > { %p14_p9 = scmp.ge.s32.totalorder %s17_s20, 6   ;;  %s2865_s16 = smov %s2276_s17 }
 0x1cd   : > { %s2866_s17 = smov %s2368_s27  ;;  %s2867_s18 = smov %s2284_s19 }
 0x1ce   : > { %s2868_s19 = smov %s2870_s22  ;;  %16 = sbr.rel (!%p14_p9) target bundleno = 4 (0x4), region = 85 }
 0x1d5   :  { %1671 = vsyncpa [#allocation3], 1 }
 0x1d6   :  { %1673 = vsyncpa [#allocation3 + $0x1], 1 }

</bundles_post_ra>
